<compile_context>
chip_gen: v6e
topology: v6e:2x2x1
jax: 0.10.0
libtpu: 0.0.40
codegen_flags: <defaults>
</compile_context>

<pallas_src>
import functools

import jax
import jax.numpy as jnp
from jax.experimental import pallas as pl
from jax.experimental.pallas import tpu as pltpu


# ------------------------------- kernels ------------------------------------


def _linear_block_kernel(x_ref, w_ref, b_ref, o_ref):
    """One (tm, K) @ (K, tn) MXU matmul; bias fused into the single store."""
    o_ref[...] = (
        jnp.dot(x_ref[...], w_ref[...], preferred_element_type=jnp.float32)
        + b_ref[...]
    ).astype(o_ref.dtype)


def _linear_ktiled_kernel(x_ref, w_ref, b_ref, o_ref):
    """K-tiled fallback: accumulate directly into the resident f32 output.

    o_ref's index_map ignores k, so the block stays VMEM-resident across the
    whole K loop -- no scratch accumulator and no extra writeback pass.
    """
    k = pl.program_id(2)

    @pl.when(k == 0)
    def _():
        o_ref[...] = jnp.zeros_like(o_ref)

    o_ref[...] += jnp.dot(
        x_ref[...], w_ref[...], preferred_element_type=jnp.float32
    )

    @pl.when(k == pl.num_programs(2) - 1)
    def _():
        o_ref[...] += b_ref[...]


# ------------------------------- wrapper -------------------------------------

_FAST_PATH_BYTES = 1 * 1024 * 1024         # tiny problems: single block, no grid
_RESIDENT_VMEM_BUDGET = 18 * 1024 * 1024   # keep W fully VMEM-resident below this
_VMEM_LIMIT = 32 * 1024 * 1024             # raised scoped-VMEM limit (safe v5e..v7x)


def _round_up(x, m):
    return ((x + m - 1) // m) * m


def _pad2(a, rows, cols):
    r, c = a.shape
    if (r, c) == (rows, cols):
        return a                            # conditional pad: no copy if aligned
    return jnp.pad(a, ((0, rows - r), (0, cols - c)))


def _choose_tiles(B, N, sub):
    # Tiles up to 512 (multiple of 256 for v6e/v7x MXU, of 128 for v5e), capped
    # at the (aligned) problem size.
    tm = min(512, _round_up(B, sub))
    tn = min(512, _round_up(N, 128))
    # v7x has 2 TensorCores: make sure >=2 "parallel" blocks exist when possible
    # so dimension_semantics=("parallel",...) can actually shard work.
    if _round_up(B, tm) // tm == 1 and _round_up(N, tn) // tn == 1:
        if B > sub:
            tm = _round_up(-(-B // 2), sub)
        elif N > 128:
            tn = _round_up(-(-N // 2), 128)
    return tm, tn


@functools.partial(jax.jit, static_argnames=("compute_dtype",))
def linear_regression_forward(x, w, b, *, compute_dtype=None):
    """x: (B, K); w: (K, N) (== torch weight.T); b: (N,). Returns x @ w + b.

    compute_dtype: optionally cast x/w (e.g. jnp.bfloat16) for the MXU while
    keeping f32 accumulation and an f32/bias path; output keeps x.dtype.
    """
    B, K = x.shape
    K2, N = w.shape
    assert K == K2 and b.shape == (N,)

    out_dtype = x.dtype
    cd = jnp.dtype(compute_dtype) if compute_dtype is not None else jnp.dtype(x.dtype)
    isize = cd.itemsize
    sub = 16 if isize == 2 else 8            # bf16 packs 16 rows per f32 sublane

    xe = x.astype(cd)
    we = w.astype(cd)
    b2 = b.astype(jnp.float32).reshape(1, N)  # bias stays f32 (added post-acc)

    # ---- Fast path: tiny problems run as a single full-array block ----------
    # (block_shape == full dims satisfies the (8,128) rule; no pad, no grid,
    #  no accumulator scaffolding, no trailing slice.)
    total_bytes = (xe.size + we.size) * isize + B * N * 4 + N * 4
    if total_bytes <= _FAST_PATH_BYTES:
        return pl.pallas_call(
            _linear_block_kernel,
            out_shape=jax.ShapeDtypeStruct((B, N), out_dtype),
        )(xe, we, b2)

    # ---- Shared tile selection ----------------------------------------------
    tm, tn = _choose_tiles(B, N, sub)
    Mp = _round_up(B, tm)
    Np = _round_up(N, tn)

    # ---- Resident-W path: no K grid axis; x and W each read exactly once ----
    resident_bytes = (
        2 * (tm * K + K * tn) * isize            # double-buffered x / w tiles
        + 2 * tm * tn * jnp.dtype(out_dtype).itemsize  # double-buffered out
        + 2 * tn * 4                             # bias tile
    )
    if resident_bytes <= _RESIDENT_VMEM_BUDGET:
        xp = _pad2(xe, Mp, K)                    # K never padded here
        wp = _pad2(we, K, Np)
        bp = _pad2(b2, 1, Np)
        grid = (Mp // tm, Np // tn)
        # NOTE: for very small N / large B*K, pipeline_mode=pl.Buffered(3) on
        # the x BlockSpec is worth sweeping to hide DMA latency.
        out = pl.pallas_call(
            _linear_block_kernel,
            out_shape=jax.ShapeDtypeStruct((Mp, Np), out_dtype),
            grid_spec=pltpu.PrefetchScalarGridSpec(
                num_scalar_prefetch=0,
                grid=grid,
                in_specs=[
                    pl.BlockSpec((tm, K), lambda i, j: (i, 0)),   # x, full K
                    pl.BlockSpec((K, tn), lambda i, j: (0, j)),   # W, full K
                    pl.BlockSpec((1, tn), lambda i, j: (0, j)),   # bias
                ],
                out_specs=pl.BlockSpec((tm, tn), lambda i, j: (i, j)),
            ),
            compiler_params=pltpu.CompilerParams(
                dimension_semantics=("parallel", "parallel"),
                vmem_limit_bytes=_VMEM_LIMIT,
            ),
            cost_estimate=pl.CostEstimate(
                flops=2 * Mp * K * Np,
                transcendentals=0,
                bytes_accessed=(Mp * K + K * Np) * isize + Mp * Np * 4 + Np * 4,
            ),
        )(xp, wp, bp)
        if (Mp, Np) != (B, N):
            out = out[:B, :N]
        return out

    # ---- K-tiled fallback (very large K): f32 output is the accumulator -----
    tk = min(512, _round_up(K, 128))
    Kp = _round_up(K, tk)
    xp = _pad2(xe, Mp, Kp)
    wp = _pad2(we, Kp, Np)
    bp = _pad2(b2, 1, Np)
    grid = (Mp // tm, Np // tn, Kp // tk)
    out = pl.pallas_call(
        _linear_ktiled_kernel,
        out_shape=jax.ShapeDtypeStruct((Mp, Np), jnp.float32),
        grid_spec=pltpu.PrefetchScalarGridSpec(
            num_scalar_prefetch=0,
            grid=grid,
            in_specs=[
                pl.BlockSpec((tm, tk), lambda i, j, k: (i, k)),
                pl.BlockSpec((tk, tn), lambda i, j, k: (k, j)),
                pl.BlockSpec((1, tn), lambda i, j, k: (0, j)),
            ],
            out_specs=pl.BlockSpec((tm, tn), lambda i, j, k: (i, j)),
        ),
        compiler_params=pltpu.CompilerParams(
            dimension_semantics=("parallel", "parallel", "arbitrary"),
            vmem_limit_bytes=_VMEM_LIMIT,
        ),
        cost_estimate=pl.CostEstimate(
            flops=2 * Mp * Kp * Np,
            transcendentals=0,
            bytes_accessed=(Mp * Kp + (Mp // tm) * Kp * Np) * isize
            + Mp * Np * 4 + Np * 4,
        ),
    )(xp, wp, bp)
    if (Mp, Np) != (B, N):
        out = out[:B, :N]
    return out.astype(out_dtype)


# --------------------------------- test --------------------------------------

if __name__ == "__main__":
    root = jax.random.PRNGKey(0)
    k_tiny, k_med, k_big = jax.random.split(root, 3)

    def make(batch, in_size, out_size, key):
        kx, kw, kb = jax.random.split(key, 3)
        x = jax.random.normal(kx, (batch, in_size), dtype=jnp.float32)
        # torch weight shape is (outputSize, inputSize); store its transpose.
        w_t = jax.random.normal(kw, (out_size, in_size), dtype=jnp.float32) * 0.1
        b = jax.random.normal(kb, (out_size,), dtype=jnp.float32) * 0.1
        return x, w_t.T, b

    def ref_fn(x, w, b):
        return (
            jnp.dot(x, w, preferred_element_type=jnp.float32,
                    precision=jax.lax.Precision.HIGHEST)
            + b
        )

    # 1) Tiny shapes matching the module spec (batch=8, inputSize=32, outputSize=16)
    #    -> single full-array block fast path (no padding, no grid).
    x, w, b = make(8, 32, 16, k_tiny)
    out = jax.block_until_ready(linear_regression_forward(x, w, b))
    assert out.shape == (8, 16) and out.dtype == x.dtype
    assert jnp.allclose(out, ref_fn(x, w, b), atol=1e-4, rtol=1e-4)

    # 2) Medium shapes -> resident-W tiled path (grid over M/N, no K loop, no pads).
    x2, w2, b2 = make(1024, 256, 512, k_med)
    ref2 = ref_fn(x2, w2, b2)
    out2 = jax.block_until_ready(linear_regression_forward(x2, w2, b2))
    assert jnp.allclose(out2, ref2, atol=1e-2, rtol=1e-2)

    # 3) Same shapes with bf16 inputs for the v6e/v7x MXU (f32 accumulation kept).
    out3 = jax.block_until_ready(
        linear_regression_forward(x2, w2, b2, compute_dtype=jnp.bfloat16)
    )
    assert jnp.allclose(out3, ref2, atol=1e-1, rtol=5e-2)

    # 4) Very large K -> K-tiled fallback accumulating directly into the f32 output.
    x4, w4, b4 = make(256, 8192, 256, k_big)
    out4 = jax.block_until_ready(linear_regression_forward(x4, w4, b4))
    assert jnp.allclose(out4, ref_fn(x4, w4, b4), atol=1e-2, rtol=1e-2)

    print("KERNEL_OK")
</pallas_src>

<mosaic_0001>
module attributes {stable_mosaic.version = 11 : i64} {
  func.func @_linear_block_kernel(%arg0: memref<8x32xf32, #tpu.memory_space<vmem>>, %arg1: memref<32x16xf32, #tpu.memory_space<vmem>>, %arg2: memref<1x16xf32, #tpu.memory_space<vmem>>, %arg3: memref<8x16xf32, #tpu.memory_space<vmem>>) attributes {dimension_semantics = [], scalar_prefetch = 0 : i64, scratch_operands = 0 : i64, tpu.core_type = #tpu.core_type<tc>} {
    %c0 = arith.constant 0 : index
    %c0_0 = arith.constant 0 : index
    %0 = vector.load %arg0[%c0, %c0_0] : memref<8x32xf32, #tpu.memory_space<vmem>>, vector<8x32xf32>
    %c0_1 = arith.constant 0 : index
    %c0_2 = arith.constant 0 : index
    %1 = vector.load %arg1[%c0_1, %c0_2] : memref<32x16xf32, #tpu.memory_space<vmem>>, vector<32x16xf32>
    %cst = arith.constant dense<0.000000e+00> : vector<8x16xf32>
    %2 = tpu.matmul %0, %1, %cst {dimension_numbers = #tpu.dot_dimension_numbers<[1], [0], [0], [1], [0, 0, 1, 1], [], []>} : vector<8x32xf32>, vector<32x16xf32>, vector<8x16xf32> -> vector<8x16xf32>
    %c0_3 = arith.constant 0 : index
    %c0_4 = arith.constant 0 : index
    %3 = vector.load %arg2[%c0_3, %c0_4] : memref<1x16xf32, #tpu.memory_space<vmem>>, vector<1x16xf32>
    %4 = vector.broadcast %3 : vector<1x16xf32> to vector<8x16xf32>
    %5 = arith.addf %2, %4 : vector<8x16xf32>
    %c0_5 = arith.constant 0 : index
    %c0_6 = arith.constant 0 : index
    %6 = vector.load %arg3[%c0_5, %c0_6] : memref<8x16xf32, #tpu.memory_space<vmem>>, vector<8x16xf32>
    tpu.vector_store %arg3[%c0_5, %c0_6], %5 {strides = array<i32>} : memref<8x16xf32, #tpu.memory_space<vmem>>, vector<8x16xf32>,
    return
  }
}

</mosaic_0001>

<bundles_post_ra>
// kernel: linear_regression_forward.1
= control target key start
LH: loop header
LB: loop body
LE: loop exit
PB: predicated region body
PF: predicated region fallthrough
CT: control target
= control target key end

     0   :  { %v160_v1 = vmov 0.0   ;;  %vm161_vm0 = vmmov 0   ;;  %s204_s0 = inlined_call_operand.vmem [shape: f32[8,32], index: 0, kind: input, shape index: {}]   ;;  %s205_s1 = inlined_call_operand.vmem [shape: f32[32,16], index: 1, kind: input, shape index: {}]   ;;  %s206_s2 = inlined_call_operand.vmem [shape: f32[1,16], index: 2, kind: input, shape index: {}]   ;;  %s207_s3 = inlined_call_operand.hbm [shape: f32[8,16], index: 3, kind: output, shape index: {}]  }
   0x1   :  { %v19_v0 = vld [vmem:[%s205_s1 + $0x18] sm:$0xff]  ;;  %124 = vmatprep.subr.mxu0 %v160_v1  ;;  %v18_v2 = vld [vmem:[%s205_s1 + $0x10] sm:$0xff]  ;;  %132 = vmatprep.mubr.msk.f32.mxu0 %vm161_vm0, %v160_v1 }
   0x2   :  { %125 = vmatpush3.msra.mxu0 %v19_v0 }
   0x3   :  { %8 = vsyncpa [#allocation3], 0  ;;  %126 = vmatprep.subr.mxu0 %v160_v1  ;;  %v17_v3 = vld [vmem:[%s205_s1 + $0x8] sm:$0xff]  ;;  %v16_v4 = vld [vmem:[%s205_s1] sm:$0xff]  ;;  %vm27_vm1 = vcmask 261120   ;;  %s162_s24 = smov [#allocation2]  }
   0x4   :  { %127 = vmatpush3.msra.mxu0 %v18_v2  ;;  %v15_v5 = vld [vmem:[%s204_s0] sm:$0xff]  ;;  %s109_s25 = sshll.u32 %s162_s24, 4  ;;  %vm101_vm2 = vcmask 130048   ;;  %s110_s25 = int_to_ptr.vmem [resolvable:$true] %s109_s25 }
   0x5   :  { %128 = vmatprep.subr.mxu0 %v160_v1  ;;  %v117_v6 = vld [vmem:[%s206_s2] ss:$0 sm:$0xff]  ;;  %s138_s1 = scalar_lea.vmem %s110_s25, 128  ;;  %p143_p1 = scmp.lt.s32.totalorder %s110_s25, %s110_s25 }
   0x6   :  { %129 = vmatpush3.msra.mxu0 %v17_v3  ;;  %p139_p0 = scmp.ne.s32.totalorder %s110_s25, %s138_s1  ;;  %p144_p2 = scmp.lt.s32.totalorder %s138_s1, %s138_s1 }
   0x7   :  { %130 = vmatprep.subr.mxu0 %v160_v1 }
   0x8   :  { %131 = vmatpush3.msra.mxu0 %v16_v4  ;;  %p145_p3 = por %p144_p2, %p143_p1 }
   0x9   :  { %133 = vmatmul.mubr.msk.f32.vlgmr.msra.gmra.mxu0 %vm27_vm1, %v15_v5 }
   0xa   :  { %p146_p4 = pnand %p145_p3, %p139_p0 }
  0xc9   :  { %v97_v7 = vpop.f32.mrf.mxu0 }
  0xca   :  { %v98_v8 = vadd.f32 %v117_v6, %v97_v7 }
  0xcb   :  { %v134_v9 = vpop.f32.mrf.mxu0 }
  0xcc   :  { %102 = vst.msk [vmem:[#allocation2] sm:$0xff] %vm101_vm2, %v98_v8 }
  0xcd   :  { %149 = shalt.err (!%p146_p4)
}
  0xce   :  { %112 = dma.vmem_to_hbm [thread:$0]  %s110_s25, 128, %s207_s3, [#allocation3]  }
  0xcf   :  { %158 = dma.done.wait [#allocation3], 128  }
  0xd0   :  { %159 = vsyncadd [#allocation3], 4294967168 }
  0xd1   :  { %116 = vsyncpa [#allocation3], 1 }

</bundles_post_ra>
